<compile_context>
chip_gen: v6e
topology: v6e:2x2x1
jax: 0.10.0
libtpu: 0.0.40
codegen_flags: <defaults>
</compile_context>

<pallas_src>
import functools

import jax
import jax.numpy as jnp
from jax import lax
from jax.experimental import pallas as pl
from jax.experimental.pallas import tpu as pltpu


def _norm_kernel_wide(x_ref, alpha_ref, bias_ref, o_ref, *, eps, inv_d, inv_dm1, cdt):
    """One row per (tile, D) tile row; reduction over the full last axis."""
    x = x_ref[...].astype(cdt)                                     # (tile, D)
    # Row mean (f32 accumulation regardless of compute dtype).
    s1 = jnp.sum(x, axis=-1, keepdims=True, dtype=jnp.float32)     # (tile, 1)
    mean = s1 * inv_d
    xc = x - mean.astype(cdt)
    # Two-pass variance: no E[x^2]-mean^2 cancellation; the second reduction is
    # free filler under the DMA bottleneck.
    s2 = jnp.sum(xc * xc, axis=-1, keepdims=True, dtype=jnp.float32)
    var = s2 * inv_dm1                                             # unbiased (ddof=1)
    std_eps = jnp.sqrt(var) + eps                                  # eps added to std (torch)
    inv = pl.reciprocal(std_eps, approx=True)                      # EUP slot
    inv = inv * (2.0 - std_eps * inv)                              # one Newton step
    alpha = alpha_ref[...].astype(cdt)                             # (1, D)
    bias = bias_ref[...].astype(cdt)                               # (1, D)
    o_ref[...] = (xc * inv.astype(cdt) * alpha + bias).astype(o_ref.dtype)


def _norm_kernel_packed(x_ref, alpha_ref, bias_ref, seg_ref, o_ref, *,
                        eps, inv_d, inv_dm1, cdt):
    """P = 128 // D rows packed per 128-lane row; segmented stats via MXU matmul."""
    x = x_ref[...].astype(cdt)                                     # (tile, P*D) lane-dense
    seg = seg_ref[...].astype(cdt)                                 # (P*D, P*D) block-diag ones
    # Per-segment sums broadcast back across each segment's lanes, on the idle MXU.
    s1 = jnp.dot(x, seg, preferred_element_type=jnp.float32,
                 precision=lax.Precision.HIGHEST)                  # (tile, P*D)
    mean = s1 * inv_d
    xc = x - mean.astype(cdt)
    s2 = jnp.dot(xc * xc, seg, preferred_element_type=jnp.float32,
                 precision=lax.Precision.HIGHEST)
    var = s2 * inv_dm1
    std_eps = jnp.sqrt(var) + eps
    inv = pl.reciprocal(std_eps, approx=True)
    inv = inv * (2.0 - std_eps * inv)
    alpha = alpha_ref[...].astype(cdt)                             # (1, P*D): alpha tiled P times
    bias = bias_ref[...].astype(cdt)
    o_ref[...] = (xc * inv.astype(cdt) * alpha + bias).astype(o_ref.dtype)


def _choose_tile_and_vmem(rows, d, itemsize):
    """Pick a row-tile size and scoped-VMEM limit (TPU-generation aware)."""
    # Sublane packing multiple: 8 rows for 4-byte dtypes, 16 for bf16, 32 for 8-bit.
    mult = {4: 8, 2: 16, 1: 32}.get(itemsize, 8)

    try:
        phys_vmem = pltpu.get_tpu_info().vmem_capacity_bytes
    except Exception:
        phys_vmem = 128 << 20                                      # v5e/v6e physical VMEM

    # Leave headroom below physical VMEM for Mosaic-internal scratch (matters on
    # v7x's 64 MiB) and never hand the kernel more than 48 MiB.
    vmem_cap = min(max(phys_vmem - (16 << 20), 16 << 20), 48 << 20)

    # Working set per tile row:
    #   2x double-buffered input block + 2x output block (input dtype)
    #   + ~3 f32-sized temporaries inside the kernel (centered x, square, out).
    row_bytes = d * itemsize
    per_row = 4 * row_bytes + 3 * d * 4
    budget = (vmem_cap * 3) // 4
    tile = max(mult, (budget // per_row // mult) * mult)

    # 256-512 rows already saturates the HBM roofline; smaller blocks deepen the
    # pipeline and balance v7x's two TensorCores.
    tile = min(tile, 512)

    # Keep >= 4 grid steps (>= 2 per v7x TensorCore) whenever the row count allows.
    quarter_rows = -(-rows // 4)                                   # ceil(rows / 4)
    quarter = max(mult, ((quarter_rows + mult - 1) // mult) * mult)
    tile = min(tile, quarter)

    # TODO(synk): rows with emb_dim so large that even an 8-row tile exceeds the
    # budget would need a D-tiled two-pass kernel; not handled here.
    needed = per_row * tile + 2 * row_bytes + (2 << 20)            # + params + slack
    vmem_limit = int(min(vmem_cap, max(needed, 16 << 20)))
    return tile, vmem_limit


def norm(x, alpha, bias, eps=1e-6):
    orig_shape = x.shape
    d = orig_shape[-1]
    x2 = x.reshape(-1, d)
    rows = x2.shape[0]
    dt = x2.dtype
    itemsize = jnp.dtype(dt).itemsize
    # Keep the heavy (tile, D) elementwise math in the input dtype when it is
    # f32/bf16 (native bf16 VPU on v6e/v7x); statistics always accumulate in f32.
    cdt = dt if dt in (jnp.dtype(jnp.float32), jnp.dtype(jnp.bfloat16)) else jnp.float32

    inv_d = 1.0 / d
    # torch.std() is unbiased (ddof=1); d == 1 intentionally yields NaN like torch.
    inv_dm1 = (1.0 / (d - 1)) if d > 1 else float("nan")

    alpha2 = alpha.reshape(1, d)
    bias2 = bias.reshape(1, d)

    # Lane packing for narrow embeddings: put 128 // d rows into each 128-lane
    # row so HBM loads/stores are full-lane (no masked partial vst.msk stores).
    pack = 128 // d if (d < 128 and 128 % d == 0) else 1
    if pack > 1 and rows % pack == 0:
        p = pack
        d_eff = p * d
        rows_eff = rows // p
        x_eff = x2.reshape(rows_eff, d_eff)                        # contiguous: free reshape
        alpha_eff = jnp.tile(alpha2, (1, p))
        bias_eff = jnp.tile(bias2, (1, p))
        lane_seg = jnp.arange(d_eff) // d
        seg = (lane_seg[:, None] == lane_seg[None, :]).astype(cdt)  # block-diagonal ones

        tile, vmem_limit = _choose_tile_and_vmem(rows_eff, d_eff, itemsize)
        grid = (pl.cdiv(rows_eff, tile),)                          # ragged last block: no pad/slice
        out = pl.pallas_call(
            functools.partial(_norm_kernel_packed, eps=eps, inv_d=inv_d,
                              inv_dm1=inv_dm1, cdt=cdt),
            out_shape=jax.ShapeDtypeStruct((rows_eff, d_eff), dt),
            grid_spec=pltpu.PrefetchScalarGridSpec(
                num_scalar_prefetch=0,
                grid=grid,
                in_specs=[
                    pl.BlockSpec((tile, d_eff), lambda i: (i, 0)),   # packed x row tile
                    pl.BlockSpec((1, d_eff), lambda i: (0, 0)),      # alpha (tiled, broadcast)
                    pl.BlockSpec((1, d_eff), lambda i: (0, 0)),      # bias  (tiled, broadcast)
                    pl.BlockSpec((d_eff, d_eff), lambda i: (0, 0)),  # segment-sum matrix
                ],
                out_specs=pl.BlockSpec((tile, d_eff), lambda i: (i, 0)),
            ),
            compiler_params=pltpu.CompilerParams(
                dimension_semantics=("parallel",),
                vmem_limit_bytes=vmem_limit,
            ),
        )(x_eff, alpha_eff, bias_eff, seg)
        return out.reshape(orig_shape)

    # TODO(synk): d < 128 with 128 % d != 0 (or rows not divisible by 128 // d)
    # still hits masked partial stores; could pad the row axis or route to XLA.
    tile, vmem_limit = _choose_tile_and_vmem(rows, d, itemsize)
    grid = (pl.cdiv(rows, tile),)                                   # ragged last block: no pad/slice
    out = pl.pallas_call(
        functools.partial(_norm_kernel_wide, eps=eps, inv_d=inv_d,
                          inv_dm1=inv_dm1, cdt=cdt),
        out_shape=jax.ShapeDtypeStruct((rows, d), dt),
        grid_spec=pltpu.PrefetchScalarGridSpec(
            num_scalar_prefetch=0,
            grid=grid,
            in_specs=[
                pl.BlockSpec((tile, d), lambda i: (i, 0)),           # x row tile
                pl.BlockSpec((1, d), lambda i: (0, 0)),              # alpha (broadcast)
                pl.BlockSpec((1, d), lambda i: (0, 0)),              # bias  (broadcast)
            ],
            out_specs=pl.BlockSpec((tile, d), lambda i: (i, 0)),
        ),
        compiler_params=pltpu.CompilerParams(
            dimension_semantics=("parallel",),
            vmem_limit_bytes=vmem_limit,
        ),
    )(x2, alpha2, bias2)
    return out.reshape(orig_shape)


if __name__ == "__main__":
    emb_dim = 32
    batch, seq = 2, 8
    key = jax.random.PRNGKey(0)
    x = jax.random.normal(key, (batch, seq, emb_dim), dtype=jnp.float32)

    # Deterministic parameter init matching nn.Parameter(torch.ones/zeros(emb_dim)).
    alpha = jnp.ones((emb_dim,), dtype=jnp.float32)
    bias = jnp.zeros((emb_dim,), dtype=jnp.float32)
    eps = 1e-6

    out = norm(x, alpha, bias, eps)
    jax.block_until_ready(out)

    # Reference check in plain JAX (unbiased std, eps added to std).
    mean = jnp.mean(x, axis=-1, keepdims=True)
    std = jnp.std(x, axis=-1, keepdims=True, ddof=1)
    ref = alpha * (x - mean) / (std + eps) + bias
    assert out.shape == x.shape
    assert jnp.allclose(out, ref, atol=2e-4, rtol=2e-4), "mismatch vs reference"

    print("KERNEL_OK")
</pallas_src>

<mosaic_0001>
module attributes {stable_mosaic.version = 11 : i64} {
  func.func @_norm_kernel_packed(%arg0: i32, %arg1: memref<8x128xf32, #tpu.memory_space<vmem>>, %arg2: memref<1x128xf32, #tpu.memory_space<vmem>>, %arg3: memref<1x128xf32, #tpu.memory_space<vmem>>, %arg4: memref<128x128xf32, #tpu.memory_space<vmem>>, %arg5: memref<8x128xf32, #tpu.memory_space<vmem>>) attributes {dimension_semantics = [#tpu.dimension_semantics<parallel>], iteration_bounds = array<i64: 1>, scalar_prefetch = 0 : i64, scratch_operands = 0 : i64, tpu.core_type = #tpu.core_type<tc>, window_params = [{transform_indices = @transform_0, window_bounds = array<i64: 8, 128>}, {pipeline_mode = #tpu.pipeline_mode<synchronous>, transform_indices = @transform_1, window_bounds = array<i64: 1, 128>}, {pipeline_mode = #tpu.pipeline_mode<synchronous>, transform_indices = @transform_2, window_bounds = array<i64: 1, 128>}, {pipeline_mode = #tpu.pipeline_mode<synchronous>, transform_indices = @transform_3, window_bounds = array<i64: 128, 128>}, {transform_indices = @transform_4, window_bounds = array<i64: 8, 128>}]} {
    %c0 = arith.constant 0 : index
    %c0_0 = arith.constant 0 : index
    %0 = vector.load %arg1[%c0, %c0_0] : memref<8x128xf32, #tpu.memory_space<vmem>>, vector<8x128xf32>
    %c0_1 = arith.constant 0 : index
    %c0_2 = arith.constant 0 : index
    %1 = vector.load %arg4[%c0_1, %c0_2] : memref<128x128xf32, #tpu.memory_space<vmem>>, vector<128x128xf32>
    %cst = arith.constant dense<0.000000e+00> : vector<8x128xf32>
    %2 = tpu.matmul %0, %1, %cst {dimension_numbers = #tpu.dot_dimension_numbers<[1], [0], [0], [1], [0, 0, 1, 1], [], []>, precision = #tpu.contract_precision<fp32>} : vector<8x128xf32>, vector<128x128xf32>, vector<8x128xf32> -> vector<8x128xf32>
    %cst_3 = arith.constant 3.125000e-02 : f32
    %3 = vector.broadcast %cst_3 : f32 to vector<8x128xf32>
    %4 = arith.mulf %2, %3 : vector<8x128xf32>
    %5 = arith.subf %0, %4 : vector<8x128xf32>
    %6 = arith.mulf %5, %5 : vector<8x128xf32>
    %cst_4 = arith.constant dense<0.000000e+00> : vector<8x128xf32>
    %7 = tpu.matmul %6, %1, %cst_4 {dimension_numbers = #tpu.dot_dimension_numbers<[1], [0], [0], [1], [0, 0, 1, 1], [], []>, precision = #tpu.contract_precision<fp32>} : vector<8x128xf32>, vector<128x128xf32>, vector<8x128xf32> -> vector<8x128xf32>
    %cst_5 = arith.constant 0.0322580636 : f32
    %8 = vector.broadcast %cst_5 : f32 to vector<8x128xf32>
    %9 = arith.mulf %7, %8 : vector<8x128xf32>
    %10 = math.sqrt %9 : vector<8x128xf32>
    %cst_6 = arith.constant 9.99999997E-7 : f32
    %11 = vector.broadcast %cst_6 : f32 to vector<8x128xf32>
    %12 = arith.addf %10, %11 : vector<8x128xf32>
    %13 = tpu.reciprocal %12 {approx = true} : vector<8x128xf32> -> vector<8x128xf32>
    %14 = arith.mulf %12, %13 : vector<8x128xf32>
    %cst_7 = arith.constant 2.000000e+00 : f32
    %15 = vector.broadcast %cst_7 : f32 to vector<8x128xf32>
    %16 = arith.subf %15, %14 : vector<8x128xf32>
    %17 = arith.mulf %13, %16 : vector<8x128xf32>
    %c0_8 = arith.constant 0 : index
    %c0_9 = arith.constant 0 : index
    %18 = vector.load %arg2[%c0_8, %c0_9] : memref<1x128xf32, #tpu.memory_space<vmem>>, vector<1x128xf32>
    %c0_10 = arith.constant 0 : index
    %c0_11 = arith.constant 0 : index
    %19 = vector.load %arg3[%c0_10, %c0_11] : memref<1x128xf32, #tpu.memory_space<vmem>>, vector<1x128xf32>
    %20 = arith.mulf %5, %17 : vector<8x128xf32>
    %21 = vector.broadcast %18 : vector<1x128xf32> to vector<8x128xf32>
    %22 = arith.mulf %20, %21 : vector<8x128xf32>
    %23 = vector.broadcast %19 : vector<1x128xf32> to vector<8x128xf32>
    %24 = arith.addf %22, %23 : vector<8x128xf32>
    %c0_12 = arith.constant 0 : index
    %c0_13 = arith.constant 0 : index
    %25 = vector.load %arg5[%c0_12, %c0_13] : memref<8x128xf32, #tpu.memory_space<vmem>>, vector<8x128xf32>
    tpu.vector_store %arg5[%c0_12, %c0_13], %24 {strides = array<i32>} : memref<8x128xf32, #tpu.memory_space<vmem>>, vector<8x128xf32>,
    return
  }
  func.func @transform_0(%arg0: i32) -> (i32, i32) {
    %c0_i32 = arith.constant 0 : i32
    %c0_i32_0 = arith.constant 0 : i32
    return %arg0, %c0_i32 : i32, i32
  }
  func.func @transform_1(%arg0: i32) -> (i32, i32) {
    %c0_i32 = arith.constant 0 : i32
    %c0_i32_0 = arith.constant 0 : i32
    %c0_i32_1 = arith.constant 0 : i32
    return %c0_i32, %c0_i32_0 : i32, i32
  }
  func.func @transform_2(%arg0: i32) -> (i32, i32) {
    %c0_i32 = arith.constant 0 : i32
    %c0_i32_0 = arith.constant 0 : i32
    %c0_i32_1 = arith.constant 0 : i32
    return %c0_i32, %c0_i32_0 : i32, i32
  }
  func.func @transform_3(%arg0: i32) -> (i32, i32) {
    %c0_i32 = arith.constant 0 : i32
    %c0_i32_0 = arith.constant 0 : i32
    %c0_i32_1 = arith.constant 0 : i32
    return %c0_i32, %c0_i32_0 : i32, i32
  }
  func.func @transform_4(%arg0: i32) -> (i32, i32) {
    %c0_i32 = arith.constant 0 : i32
    %c0_i32_0 = arith.constant 0 : i32
    return %arg0, %c0_i32 : i32, i32
  }
}

</mosaic_0001>

<bundles_post_ra>
// kernel: tpu_custom_call.1
= control target key start
LH: loop header
LB: loop body
LE: loop exit
PB: predicated region body
PF: predicated region fallthrough
CT: control target
= control target key end

     0   :  { %9 = vsyncpa [#allocation3], 0  ;;  %s2793_s0 = inlined_call_operand.hbm [shape: f32[4,128], index: 0, kind: input, shape index: {}]   ;;  %s2794_s1 = inlined_call_operand.vmem [shape: f32[1,128], index: 1, kind: input, shape index: {}]   ;;  %s2795_s2 = inlined_call_operand.vmem [shape: f32[1,128], index: 2, kind: input, shape index: {}]   ;;  %s2796_s3 = inlined_call_operand.hbm [shape: f32[128,128], index: 3, kind: input, shape index: {}]   ;;  %s2797_s4 = inlined_call_operand.hbm [shape: f32[4,128], index: 4, kind: output, shape index: {}]  }
   0x1   :  { %10 = vsyncpa [#allocation6], 0 }
   0x2   :  { %11 = vsyncpa [#allocation4], 0 }
   0x3   :  { %16 = vsyncadd [#allocation3], 64  ;;  %s2102_s15 = smov [#allocation2]  }
   0x4   :  { %s17_s16 = sshll.u32 %s2102_s15, 4  ;;  %s18_s16 = int_to_ptr.vmem [resolvable:$true] %s17_s16 }
   0x5   :  { %s2044_s17 = scalar_lea.vmem %s18_s16, 64  ;;  %s2048_s18 = scalar_lea.vmem %s18_s16, 128 }
   0x6   :  { %p2045_p0 = scmp.ne.s32.totalorder %s18_s16, %s2044_s17  ;;  %p2049_p1 = scmp.lt.s32.totalorder %s18_s16, %s18_s16 }
   0x7   :  { %p2050_p2 = scmp.lt.s32.totalorder %s2048_s18, %s2044_s17 }
   0x9   :  { %p2051_p3 = por %p2050_p2, %p2049_p1 }
   0xb   :  { %p2052_p4 = pnand %p2051_p3, %p2045_p0 }
   0xd   :  { %2055 = shalt.err (!%p2052_p4)
}
   0xe   :  { %s2103_s19 = smov 64   ;;  %s2104_s20 = smov 4  }
   0xf   :  { %23 = dma.hbm_to_vmem [thread:$0]  %s2793_s0, 64, %s18_s16, [#allocation3], %s2103_s19, %s2103_s19, %s2104_s20  }
  0x10   :  { %s2105_s23 = smov [#allocation5]  }
  0x11   :  { %s33_s24 = sshll.u32 %s2105_s23, 4  ;;  %s34_s24 = int_to_ptr.vmem [resolvable:$true] %s33_s24 }
  0x12   :  { %s2064_s25 = scalar_lea.vmem %s34_s24, 2048  ;;  %p2069_p6 = scmp.lt.s32.totalorder %s34_s24, %s34_s24 }
  0x13   :  { %p2065_p5 = scmp.ne.s32.totalorder %s34_s24, %s2064_s25  ;;  %p2070_p7 = scmp.lt.s32.totalorder %s2064_s25, %s2064_s25 }
  0x15   :  { %p2071_p8 = por %p2070_p7, %p2069_p6 }
  0x17   :  { %p2072_p9 = pnand %p2071_p8, %p2065_p5 }
  0x19   :  { %2075 = shalt.err (!%p2072_p9)
}
  0x1a   :  { %s2106_s26 = smov 128   ;;  %s2107_s27 = smov 8  }
  0x1b   :  { %39 = dma.hbm_to_vmem [thread:$0]  %s2796_s3, 2048, %s34_s24, [#allocation6], %s2106_s26, %s2106_s26, %s2107_s27  }
  0x1c   :  { %2096 = dma.done.wait [#allocation3], 128  }
  0x1d   :  { %2097 = vsyncadd [#allocation3], 4294967168 }
  0x1e   :  { %2098 = dma.done.wait [#allocation6], 2048  }
  0x1f   :  { %2099 = vsyncadd [#allocation6], 4294965248  ;;  %v2810_v0 = vmov 0.0   ;;  %vm2109_vm0 = vmmov 0   ;;  %v62_v1 = vld [vmem:[#allocation5 + $0x78] sm:$0xff]  ;;  %v61_v2 = vld [vmem:[#allocation5 + $0x70] sm:$0xff] }
  0x20   :  { %1603 = vmatprep.subr.mxu0 %v2810_v0  ;;  %1638 = vmatprep.subr.mxu1 %v2810_v0  ;;  %v60_v3 = vld [vmem:[#allocation5 + $0x68] sm:$0xff]  ;;  %v2151_v4 = vand.u32 4294901760, %v62_v1  ;;  %v2153_v5 = vand.u32 4294901760, %v61_v2  ;;  %v59_v7 = vld [vmem:[#allocation5 + $0x60] sm:$0xff]  ;;  %v58_v8 = vld [vmem:[#allocation5 + $0x58] sm:$0xff] }
  0x21   :  { %1635 = vmatprep.mubr.msk.f32.mxu0 %vm2109_vm0, %v2810_v0  ;;  %1670 = vmatprep.mubr.msk.f32.mxu1 %vm2109_vm0, %v2810_v0  ;;  %v2155_v6 = vand.u32 4294901760, %v60_v3  ;;  %v57_v9 = vld [vmem:[#allocation5 + $0x50] sm:$0xff]  ;;  %v2157_v10 = vand.u32 4294901760, %v59_v7  ;;  %v2159_v11 = vand.u32 4294901760, %v58_v8  ;;  %v56_v13 = vld [vmem:[#allocation5 + $0x48] sm:$0xff]  ;;  %v55_v14 = vld [vmem:[#allocation5 + $0x40] sm:$0xff] }
  0x22   :  { %v2161_v12 = vand.u32 4294901760, %v57_v9  ;;  %1604 = vmatpush3.msra.mxu0 %v2151_v4  ;;  %v2165_v15 = vsub.f32 %v62_v1, %v2151_v4  ;;  %v2168_v16 = vsub.f32 %v61_v2, %v2153_v5  ;;  %v2170_v17 = vand.u32 4294901760, %v56_v13  ;;  %v54_v19 = vld [vmem:[#allocation5 + $0x38] sm:$0xff]  ;;  %v53_v26 = vld [vmem:[#allocation5 + $0x30] sm:$0xff]  ;;  %v52_v36 = vld [vmem:[#allocation5 + $0x28] sm:$0xff] }
  0x23   :  { %v2173_v18 = vsub.f32 %v60_v3, %v2155_v6  ;;  %1605 = vmatprep.subr.mxu0 %v2810_v0  ;;  %v2177_v20 = vsub.f32 %v59_v7, %v2157_v10  ;;  %v2180_v21 = vsub.f32 %v58_v8, %v2159_v11  ;;  %v2192_v25 = vand.u32 4294901760, %v55_v14  ;;  %v51_v41 = vld [vmem:[#allocation5 + $0x20] sm:$0xff]  ;;  %v50_v49 = vld [vmem:[#allocation5 + $0x18] sm:$0xff]  ;;  %v49_v54 = vld [vmem:[#allocation5 + $0x10] sm:$0xff] }
  0x24   :  { %1606 = vmatpush3.msra.mxu0 %v2153_v5  ;;  %v2184_v22 = vand.u32 4294901760, %v2165_v15  ;;  %v2187_v23 = vand.u32 4294901760, %v2168_v16  ;;  %v2198_v28 = vand.u32 4294901760, %v54_v19  ;;  %v2204_v30 = vsub.f32 %v57_v9, %v2161_v12  ;;  %v2251_v50 = vld [vmem:[#allocation2] sm:$0xff]  ;;  %v48_v60 = vld [vmem:[#allocation5 + $0x8] sm:$0xff]  ;;  %v47_v7 = vld [vmem:[#allocation5] sm:$0xff] }
  0x25   :  { %v2190_v24 = vand.u32 4294901760, %v2173_v18  ;;  %1607 = vmatprep.subr.mxu0 %v2810_v0  ;;  %v2196_v27 = vand.u32 4294901760, %v2177_v20  ;;  %v2201_v29 = vand.u32 4294901760, %v2180_v21  ;;  %v2214_v34 = vsub.f32 %v56_v13, %v2170_v17  ;;  %2812 = vst [vmem:[#allocation11_spill] sm:$0xff] %v2251_v50 }
  0x26   :  { %1608 = vmatpush3.msra.mxu0 %v2155_v6  ;;  %v158_v31 = vsub.f32 %v2165_v15, %v2184_v22  ;;  %v165_v32 = vsub.f32 %v2168_v16, %v2187_v23  ;;  %v2217_v35 = vand.u32 4294901760, %v53_v26  ;;  %v2227_v40 = vand.u32 4294901760, %v2204_v30 }
  0x27   :  { %v172_v33 = vsub.f32 %v2173_v18, %v2190_v24  ;;  %1609 = vmatprep.subr.mxu0 %v2810_v0  ;;  %v179_v39 = vsub.f32 %v2177_v20, %v2196_v27  ;;  %v186_v42 = vsub.f32 %v2180_v21, %v2201_v29  ;;  %v2233_v43 = vsub.f32 %v55_v14, %v2192_v25 }
  0x28   :  { %1610 = vmatpush3.msra.mxu0 %v2157_v10  ;;  %v2220_v37 = vand.u32 4294901760, %v158_v31  ;;  %v2222_v38 = vand.u32 4294901760, %v165_v32  ;;  %v2239_v45 = vand.u32 4294901760, %v52_v36  ;;  %v2242_v46 = vand.u32 4294901760, %v2214_v34 }
  0x29   :  { %1611 = vmatprep.subr.mxu0 %v2810_v0  ;;  %v2237_v44 = vand.u32 4294901760, %v172_v33  ;;  %v2245_v47 = vsub.f32 %v54_v19, %v2198_v28  ;;  %v2249_v48 = vand.u32 4294901760, %v51_v41  ;;  %v2255_v51 = vand.u32 4294901760, %v179_v39 }
  0x2a   :  { %1612 = vmatpush3.msra.mxu0 %v2159_v11  ;;  %1639 = vmatpush3.msra.mxu1 %v2220_v37  ;;  %v193_v52 = vsub.f32 %v2204_v30, %v2227_v40  ;;  %v2260_v53 = vand.u32 4294901760, %v2233_v43  ;;  %v2263_v55 = vsub.f32 %v53_v26, %v2217_v35  ;;  %v2267_v56 = vand.u32 4294901760, %v186_v42 }
  0x2b   :  { %1613 = vmatprep.subr.mxu0 %v2810_v0  ;;  %1640 = vmatprep.subr.mxu1 %v2810_v0  ;;  %2813 = vst [vmem:[#allocation12_spill] sm:$0xff] %v2255_v51  ;;  %v2270_v57 = vand.u32 4294901760, %v2245_v47  ;;  %v200_v58 = vsub.f32 %v2214_v34, %v2242_v46  ;;  %v2276_v59 = vand.u32 4294901760, %v50_v49  ;;  %v2279_v61 = vsub.f32 %v52_v36, %v2239_v45 }
  0x2c   :  { %1614 = vmatpush3.msra.mxu0 %v2161_v12  ;;  %1641 = vmatpush3.msra.mxu1 %v2222_v38  ;;  %2814 = vst [vmem:[#allocation13_spill] sm:$0xff] %v2267_v56  ;;  %v2282_v62 = vand.u32 4294901760, %v2251_v50  ;;  %v2286_v63 = vand.u32 4294901760, %v49_v54  ;;  %v2290_v1 = vand.u32 4294901760, %v193_v52  ;;  %v207_v2 = vsub.f32 %v2233_v43, %v2260_v53 }
  0x2d   :  { %1615 = vmatprep.subr.mxu0 %v2810_v0  ;;  %1642 = vmatprep.subr.mxu1 %v2810_v0  ;;  %v2295_v3 = vand.u32 4294901760, %v2263_v55  ;;  %v2298_v8 = vsub.f32 %v51_v41, %v2249_v48  ;;  %v214_v9 = vsub.f32 %v2245_v47, %v2270_v57  ;;  %v2304_v13 = vand.u32 4294901760, %v48_v60 }
  0x2e   :  { %1616 = vmatpush3.msra.mxu0 %v2170_v17  ;;  %1643 = vmatpush3.msra.mxu1 %v2237_v44  ;;  %2815 = vst [vmem:[#allocation14_spill] sm:$0xff] %v2290_v1  ;;  %v2308_v14 = vand.u32 4294901760, %v200_v58  ;;  %v2311_v19 = vand.u32 4294901760, %v2279_v61  ;;  %v2315_v26 = vsub.f32 %v2251_v50, %v2282_v62  ;;  %v2318_v31 = vsub.f32 %v50_v49, %v2276_v59 }
  0x2f   :  { %1617 = vmatprep.subr.mxu0 %v2810_v0  ;;  %1644 = vmatprep.subr.mxu1 %v2810_v0  ;;  %v2322_v32 = vand.u32 4294901760, %v47_v7  ;;  %v2326_v33 = vand.u32 4294901760, %v207_v2  ;;  %v221_v36 = vsub.f32 %v2263_v55, %v2295_v3  ;;  %v2331_v39 = vand.u32 4294901760, %v2298_v8 }
  0x30   :  { %1618 = vmatpush3.msra.mxu0 %v2192_v25  ;;  %1645 = vmatpush3.msra.mxu1 %v2255_v51  ;;  %2816 = vst [vmem:[#allocation15_spill] sm:$0xff] %v2308_v14  ;;  %v2334_v41 = vsub.f32 %v49_v54, %v2286_v63  ;;  %v2338_v42 = vand.u32 4294901760, %v214_v9  ;;  %v228_v49 = vsub.f32 %v2279_v61, %v2311_v19  ;;  %v2346_v58 = vand.u32 4294901760, %v2318_v31 }
  0x31   :  { %1619 = vmatprep.subr.mxu0 %v2810_v0  ;;  %1646 = vmatprep.subr.mxu1 %v2810_v0  ;;  %2817 = vst [vmem:[#allocation16_spill] sm:$0xff] %v2326_v33  ;;  %v2349_v54 = vsub.f32 %v48_v60, %v2304_v13  ;;  %v2355_v2 = vand.u32 4294901760, %v221_v36  ;;  %v235_v9 = vsub.f32 %v2298_v8, %v2331_v39  ;;  %v2822_v36 = vand.u32 4294901760, %v2315_v26 }
  0x32   :  { %1620 = vmatpush3.msra.mxu0 %v2198_v28  ;;  %1647 = vmatpush3.msra.mxu1 %v2267_v56  ;;  %2818 = vst [vmem:[#allocation17_spill] sm:$0xff] %v2338_v42  ;;  %2819 = vst [vmem:[#allocation18_spill] sm:$0xff] %v2346_v58  ;;  %v2360_v52 = vand.u32 4294901760, %v2334_v41  ;;  %v2363_v50 = vsub.f32 %v47_v7, %v2322_v32  ;;  %v2369_v60 = vand.u32 4294901760, %v228_v49 }
  0x33   :  { %1621 = vmatprep.subr.mxu0 %v2810_v0  ;;  %1648 = vmatprep.subr.mxu1 %v2810_v0  ;;  %2820 = vst [vmem:[#allocation19_spill] sm:$0xff] %v2355_v2  ;;  %v2377_v7 = vand.u32 4294901760, %v2349_v54  ;;  %v2383_v49 = vand.u32 4294901760, %v235_v9 }
  0x34   :  { %1622 = vmatpush3.msra.mxu0 %v2217_v35  ;;  %1649 = vmatpush3.msra.mxu1 %v2290_v1  ;;  %2821 = vst [vmem:[#allocation20_spill] sm:$0xff] %v2360_v52 }
  0x35   :  { %1623 = vmatprep.subr.mxu0 %v2810_v0  ;;  %1650 = vmatprep.subr.mxu1 %v2810_v0  ;;  %2823 = vst [vmem:[#allocation21_spill] sm:$0xff] %v2377_v7  ;;  %v256_v9 = vsub.f32 %v2349_v54, %v2377_v7 }
  0x36   :  { %1624 = vmatpush3.msra.mxu0 %v2239_v45  ;;  %1651 = vmatpush3.msra.mxu1 %v2308_v14  ;;  %v242_v14 = vsub.f32 %v2318_v31, %v2346_v58 }
  0x37   :  { %1625 = vmatprep.subr.mxu0 %v2810_v0  ;;  %1652 = vmatprep.subr.mxu1 %v2810_v0 }
  0x38   :  { %1626 = vmatpush3.msra.mxu0 %v2249_v48  ;;  %1653 = vmatpush3.msra.mxu1 %v2326_v33  ;;  %v147_v33 = vsub.f32 %v2315_v26, %v2822_v36  ;;  %v2388_v36 = vand.u32 4294901760, %v2363_v50  ;;  %v2394_v56 = vand.u32 4294901760, %v242_v14  ;;  %v2409_v14 = vand.u32 4294901760, %v256_v9 }
  0x39   :  { %1627 = vmatprep.subr.mxu0 %v2810_v0  ;;  %1654 = vmatprep.subr.mxu1 %v2810_v0 }
  0x3a   :  { %1628 = vmatpush3.msra.mxu0 %v2276_v59  ;;  %1655 = vmatpush3.msra.mxu1 %v2338_v42  ;;  %v249_v42 = vsub.f32 %v2334_v41, %v2360_v52  ;;  %2824 = vst [vmem:[#allocation22_spill] sm:$0xff] %v2388_v36  ;;  %v148_v1 = vand.u32 4294901760, %v147_v33  ;;  %v263_v51 = vsub.f32 %v2363_v50, %v2388_v36 }
  0x3b   :  { %1629 = vmatprep.subr.mxu0 %v2810_v0  ;;  %1656 = vmatprep.subr.mxu1 %v2810_v0 }
  0x3c   :  { %1630 = vmatpush3.msra.mxu0 %v2286_v63  ;;  %1657 = vmatpush3.msra.mxu1 %v2355_v2  ;;  %v2402_v2 = vand.u32 4294901760, %v249_v42  ;;  %v2415_v33 = vand.u32 4294901760, %v263_v51  ;;  %v2825_v51 = vand.u32 4294901760, %v2315_v26  ;;  %v2832_v42 = vld [vmem:[#allocation19_spill] sm:$0xff] }
  0x3d   :  { %1631 = vmatprep.subr.mxu0 %v2810_v0  ;;  %1658 = vmatprep.subr.mxu1 %v2810_v0 }
  0x3e   :  { %1632 = vmatpush3.msra.mxu0 %v2304_v13  ;;  %1659 = vmatpush3.msra.mxu1 %v2369_v60 }
  0x3f   :  { %1633 = vmatprep.subr.mxu0 %v2810_v0  ;;  %1660 = vmatprep.subr.mxu1 %v2810_v0 }
  0x40   :  { %1634 = vmatpush3.msra.mxu0 %v2322_v32  ;;  %1661 = vmatpush3.msra.mxu1 %v2383_v49 }
  0x41   :  { %1662 = vmatprep.subr.mxu1 %v2810_v0  ;;  %1673 = vmatprep.subr.mxu0 %v2810_v0 }
  0x42   :  { %1636 = vmatmul.mubr.f32.vlgmr.msra.gmra.mxu0 %v148_v1  ;;  %1663 = vmatpush3.msra.mxu1 %v2394_v56  ;;  %v2830_v1 = vld [vmem:[#allocation16_spill] sm:$0xff] }
  0x43   :  { %1674 = vmatpush3.msra.mxu0 %v2165_v15  ;;  %1664 = vmatprep.subr.mxu1 %v2810_v0 }
  0x44   :  { %1675 = vmatprep.subr.mxu0 %v2810_v0  ;;  %1665 = vmatpush3.msra.mxu1 %v2402_v2 }
  0x45   :  { %1676 = vmatpush3.msra.mxu0 %v2168_v16  ;;  %1666 = vmatprep.subr.mxu1 %v2810_v0 }
  0x46   :  { %1677 = vmatprep.subr.mxu0 %v2810_v0  ;;  %1667 = vmatpush3.msra.mxu1 %v2409_v14 }
  0x47   :  { %1678 = vmatpush3.msra.mxu0 %v2173_v18  ;;  %1668 = vmatprep.subr.mxu1 %v2810_v0 }
  0x48   :  { %1679 = vmatprep.subr.mxu0 %v2810_v0  ;;  %1669 = vmatpush3.msra.mxu1 %v2415_v33 }
  0x49   :  { %1680 = vmatpush3.msra.mxu0 %v2177_v20  ;;  %1671 = vmatmul.mubr.f32.vlgmr.msra.gmra.mxu1 %v2282_v62 }
  0x4a   :  { %1681 = vmatprep.subr.mxu0 %v2810_v0  ;;  %1708 = vmatprep.subr.mxu1 %v2810_v0 }
  0x4b   :  { %1682 = vmatpush3.msra.mxu0 %v2180_v21  ;;  %1709 = vmatpush3.msra.mxu1 %v2151_v4 }
  0x4c   :  { %1683 = vmatprep.subr.mxu0 %v2810_v0  ;;  %1710 = vmatprep.subr.mxu1 %v2810_v0 }
  0x4d   :  { %1684 = vmatpush3.msra.mxu0 %v2204_v30  ;;  %1711 = vmatpush3.msra.mxu1 %v2153_v5 }
  0x4e   :  { %1685 = vmatprep.subr.mxu0 %v2810_v0  ;;  %1712 = vmatprep.subr.mxu1 %v2810_v0 }
  0x4f   :  { %1686 = vmatpush3.msra.mxu0 %v2214_v34  ;;  %1713 = vmatpush3.msra.mxu1 %v2155_v6 }
  0x50   :  { %1687 = vmatprep.subr.mxu0 %v2810_v0  ;;  %1714 = vmatprep.subr.mxu1 %v2810_v0 }
  0x51   :  { %1688 = vmatpush3.msra.mxu0 %v2233_v43  ;;  %1715 = vmatpush3.msra.mxu1 %v2157_v10 }
  0x52   :  { %1689 = vmatprep.subr.mxu0 %v2810_v0  ;;  %1716 = vmatprep.subr.mxu1 %v2810_v0 }
  0x53   :  { %1690 = vmatpush3.msra.mxu0 %v2245_v47  ;;  %1717 = vmatpush3.msra.mxu1 %v2159_v11 }
  0x54   :  { %1691 = vmatprep.subr.mxu0 %v2810_v0  ;;  %1718 = vmatprep.subr.mxu1 %v2810_v0 }
  0x55   :  { %1692 = vmatpush3.msra.mxu0 %v2263_v55  ;;  %1719 = vmatpush3.msra.mxu1 %v2161_v12 }
  0x56   :  { %1693 = vmatprep.subr.mxu0 %v2810_v0  ;;  %1720 = vmatprep.subr.mxu1 %v2810_v0 }
  0x57   :  { %1694 = vmatpush3.msra.mxu0 %v2279_v61  ;;  %1721 = vmatpush3.msra.mxu1 %v2170_v17 }
  0x58   :  { %1695 = vmatprep.subr.mxu0 %v2810_v0  ;;  %1722 = vmatprep.subr.mxu1 %v2810_v0 }
  0x59   :  { %1696 = vmatpush3.msra.mxu0 %v2298_v8  ;;  %1723 = vmatpush3.msra.mxu1 %v2192_v25 }
  0x5a   :  { %1697 = vmatprep.subr.mxu0 %v2810_v0  ;;  %1724 = vmatprep.subr.mxu1 %v2810_v0 }
  0x5b   :  { %1698 = vmatpush3.msra.mxu0 %v2318_v31  ;;  %1725 = vmatpush3.msra.mxu1 %v2198_v28 }
  0x5c   :  { %1699 = vmatprep.subr.mxu0 %v2810_v0  ;;  %1726 = vmatprep.subr.mxu1 %v2810_v0 }
  0x5d   :  { %1700 = vmatpush3.msra.mxu0 %v2334_v41  ;;  %1727 = vmatpush3.msra.mxu1 %v2217_v35 }
  0x5e   :  { %1701 = vmatprep.subr.mxu0 %v2810_v0  ;;  %1728 = vmatprep.subr.mxu1 %v2810_v0 }
  0x5f   :  { %1702 = vmatpush3.msra.mxu0 %v2349_v54  ;;  %1729 = vmatpush3.msra.mxu1 %v2239_v45 }
  0x60   :  { %1703 = vmatprep.subr.mxu0 %v2810_v0  ;;  %1730 = vmatprep.subr.mxu1 %v2810_v0 }
  0x61   :  { %1704 = vmatpush3.msra.mxu0 %v2363_v50  ;;  %1705 = vmatprep.mubr.msk.f32.mxu0 %vm2109_vm0, %v2810_v0 }
  0x62   :  { %1731 = vmatpush3.msra.mxu1 %v2249_v48  ;;  %1706 = vmatmul.mubr.f32.vlgmr.msra.gmra.mxu0 %v2315_v26  ;;  %v2831_v26 = vld [vmem:[#allocation17_spill] sm:$0xff] }
  0x63   :  { %1732 = vmatprep.subr.mxu1 %v2810_v0  ;;  %1743 = vmatprep.subr.mxu0 %v2810_v0 }
  0x64   :  { %1733 = vmatpush3.msra.mxu1 %v2276_v59  ;;  %1744 = vmatpush3.msra.mxu0 %v2184_v22 }
  0x65   :  { %1734 = vmatprep.subr.mxu1 %v2810_v0  ;;  %1745 = vmatprep.subr.mxu0 %v2810_v0 }
  0x66   :  { %1735 = vmatpush3.msra.mxu1 %v2286_v63  ;;  %1746 = vmatpush3.msra.mxu0 %v2187_v23 }
  0x67   :  { %1736 = vmatprep.subr.mxu1 %v2810_v0  ;;  %1747 = vmatprep.subr.mxu0 %v2810_v0 }
  0x68   :  { %1737 = vmatpush3.msra.mxu1 %v2304_v13  ;;  %1748 = vmatpush3.msra.mxu0 %v2190_v24 }
  0x69   :  { %1738 = vmatprep.subr.mxu1 %v2810_v0  ;;  %1749 = vmatprep.subr.mxu0 %v2810_v0 }
  0x6a   :  { %1739 = vmatpush3.msra.mxu1 %v2322_v32  ;;  %1740 = vmatprep.mubr.msk.f32.mxu1 %vm2109_vm0, %v2810_v0 }
  0x6b   :  { %1750 = vmatpush3.msra.mxu0 %v2196_v27  ;;  %1741 = vmatmul.mubr.f32.vlgmr.msra.gmra.mxu1 %v2825_v51 }
  0x6c   :  { %1751 = vmatprep.subr.mxu0 %v2810_v0  ;;  %1778 = vmatprep.subr.mxu1 %v2810_v0 }
  0x6d   :  { %1752 = vmatpush3.msra.mxu0 %v2201_v29  ;;  %1779 = vmatpush3.msra.mxu1 %v2151_v4 }
  0x6e   :  { %1753 = vmatprep.subr.mxu0 %v2810_v0  ;;  %1780 = vmatprep.subr.mxu1 %v2810_v0 }
  0x6f   :  { %1754 = vmatpush3.msra.mxu0 %v2227_v40  ;;  %1781 = vmatpush3.msra.mxu1 %v2153_v5 }
  0x70   :  { %1755 = vmatprep.subr.mxu0 %v2810_v0  ;;  %1782 = vmatprep.subr.mxu1 %v2810_v0 }
  0x71   :  { %1756 = vmatpush3.msra.mxu0 %v2242_v46  ;;  %1783 = vmatpush3.msra.mxu1 %v2155_v6 }
  0x72   :  { %1757 = vmatprep.subr.mxu0 %v2810_v0  ;;  %1784 = vmatprep.subr.mxu1 %v2810_v0 }
  0x73   :  { %1758 = vmatpush3.msra.mxu0 %v2260_v53  ;;  %1785 = vmatpush3.msra.mxu1 %v2157_v10 }
  0x74   :  { %1759 = vmatprep.subr.mxu0 %v2810_v0  ;;  %1786 = vmatprep.subr.mxu1 %v2810_v0 }
  0x75   :  { %1760 = vmatpush3.msra.mxu0 %v2270_v57  ;;  %1787 = vmatpush3.msra.mxu1 %v2159_v11 }
  0x76   :  { %1761 = vmatprep.subr.mxu0 %v2810_v0  ;;  %1788 = vmatprep.subr.mxu1 %v2810_v0 }
  0x77   :  { %1762 = vmatpush3.msra.mxu0 %v2295_v3  ;;  %1789 = vmatpush3.msra.mxu1 %v2161_v12 }
  0x78   :  { %1763 = vmatprep.subr.mxu0 %v2810_v0  ;;  %1790 = vmatprep.subr.mxu1 %v2810_v0 }
  0x79   :  { %1764 = vmatpush3.msra.mxu0 %v2311_v19  ;;  %1791 = vmatpush3.msra.mxu1 %v2170_v17 }
  0x7a   :  { %1765 = vmatprep.subr.mxu0 %v2810_v0  ;;  %1792 = vmatprep.subr.mxu1 %v2810_v0 }
  0x7b   :  { %1766 = vmatpush3.msra.mxu0 %v2331_v39  ;;  %1793 = vmatpush3.msra.mxu1 %v2192_v25 }
  0x7c   :  { %1767 = vmatprep.subr.mxu0 %v2810_v0  ;;  %1794 = vmatprep.subr.mxu1 %v2810_v0 }
  0x7d   :  { %1768 = vmatpush3.msra.mxu0 %v2346_v58  ;;  %1795 = vmatpush3.msra.mxu1 %v2198_v28  ;;  %v2833_v58 = vld [vmem:[#allocation11_spill] sm:$0xff] }
  0x7e   :  { %1769 = vmatprep.subr.mxu0 %v2810_v0  ;;  %1796 = vmatprep.subr.mxu1 %v2810_v0 }
  0x7f   :  { %1770 = vmatpush3.msra.mxu0 %v2360_v52  ;;  %1797 = vmatpush3.msra.mxu1 %v2217_v35 }
  0x80   :  { %1771 = vmatprep.subr.mxu0 %v2810_v0  ;;  %1798 = vmatprep.subr.mxu1 %v2810_v0 }
  0x81   :  { %1772 = vmatpush3.msra.mxu0 %v2377_v7  ;;  %1799 = vmatpush3.msra.mxu1 %v2239_v45 }
  0x82   :  { %1773 = vmatprep.subr.mxu0 %v2810_v0  ;;  %1800 = vmatprep.subr.mxu1 %v2810_v0 }
  0x83   :  { %1774 = vmatpush3.msra.mxu0 %v2388_v36  ;;  %1775 = vmatprep.mubr.msk.f32.mxu0 %vm2109_vm0, %v2810_v0 }
  0x84   :  { %1801 = vmatpush3.msra.mxu1 %v2249_v48  ;;  %1776 = vmatmul.mubr.f32.vlgmr.msra.gmra.mxu0 %v2282_v62 }
  0x85   :  { %1802 = vmatprep.subr.mxu1 %v2810_v0  ;;  %1810 = vmatprep.mubr.msk.f32.mxu1 %vm2109_vm0, %v2810_v0 }
  0x86   :  { %1803 = vmatpush3.msra.mxu1 %v2276_v59  ;;  %1813 = vmatprep.subr.mxu0 %v2810_v0 }
  0x87   :  { %1804 = vmatprep.subr.mxu1 %v2810_v0  ;;  %1814 = vmatpush3.msra.mxu0 %v2151_v4 }
  0x88   :  { %1805 = vmatpush3.msra.mxu1 %v2286_v63  ;;  %1815 = vmatprep.subr.mxu0 %v2810_v0 }
  0x89   :  { %1806 = vmatprep.subr.mxu1 %v2810_v0  ;;  %1816 = vmatpush3.msra.mxu0 %v2153_v5 }
  0x8a   :  { %1807 = vmatpush3.msra.mxu1 %v2304_v13  ;;  %1817 = vmatprep.subr.mxu0 %v2810_v0 }
  0x8b   :  { %1808 = vmatprep.subr.mxu1 %v2810_v0  ;;  %1818 = vmatpush3.msra.mxu0 %v2155_v6 }
  0x8c   :  { %1809 = vmatpush3.msra.mxu1 %v2322_v32  ;;  %1819 = vmatprep.subr.mxu0 %v2810_v0 }
  0x8d   :  { %1811 = vmatmul.mubr.f32.vlgmr.msra.gmra.mxu1 %v2282_v62  ;;  %1848 = vmatprep.subr.mxu1 %v2810_v0  ;;  %v2829_v62 = vld [vmem:[#allocation15_spill] sm:$0xff] }
  0x8e   :  { %1849 = vmatpush3.msra.mxu1 %v2220_v37  ;;  %1820 = vmatpush3.msra.mxu0 %v2157_v10  ;;  %v2826_v37 = vld [vmem:[#allocation12_spill] sm:$0xff] }
  0x8f   :  { %1850 = vmatprep.subr.mxu1 %v2810_v0  ;;  %1821 = vmatprep.subr.mxu0 %v2810_v0 }
  0x90   :  { %1851 = vmatpush3.msra.mxu1 %v2222_v38  ;;  %1822 = vmatpush3.msra.mxu0 %v2159_v11  ;;  %v2827_v38 = vld [vmem:[#allocation13_spill] sm:$0xff] }
  0x91   :  { %1852 = vmatprep.subr.mxu1 %v2810_v0  ;;  %1823 = vmatprep.subr.mxu0 %v2810_v0 }
  0x92   :  { %1853 = vmatpush3.msra.mxu1 %v2237_v44  ;;  %1824 = vmatpush3.msra.mxu0 %v2161_v12  ;;  %v2828_v44 = vld [vmem:[#allocation14_spill] sm:$0xff] }
  0x93   :  { %1854 = vmatprep.subr.mxu1 %v2810_v0  ;;  %1825 = vmatprep.subr.mxu0 %v2810_v0 }
  0x94   :  { %1855 = vmatpush3.msra.mxu1 %v2826_v37  ;;  %1826 = vmatpush3.msra.mxu0 %v2170_v17 }
  0x95   :  { %1856 = vmatprep.subr.mxu1 %v2810_v0  ;;  %1827 = vmatprep.subr.mxu0 %v2810_v0 }
  0x96   :  { %1857 = vmatpush3.msra.mxu1 %v2827_v38  ;;  %1828 = vmatpush3.msra.mxu0 %v2192_v25 }
  0x97   :  { %1858 = vmatprep.subr.mxu1 %v2810_v0  ;;  %1829 = vmatprep.subr.mxu0 %v2810_v0 }
  0x98   :  { %1859 = vmatpush3.msra.mxu1 %v2828_v44  ;;  %1830 = vmatpush3.msra.mxu0 %v2198_v28 }
  0x99   :  { %1860 = vmatprep.subr.mxu1 %v2810_v0  ;;  %1831 = vmatprep.subr.mxu0 %v2810_v0 }
  0x9a   :  { %1861 = vmatpush3.msra.mxu1 %v2829_v62  ;;  %1832 = vmatpush3.msra.mxu0 %v2217_v35 }
  0x9b   :  { %1862 = vmatprep.subr.mxu1 %v2810_v0  ;;  %1833 = vmatprep.subr.mxu0 %v2810_v0 }
  0x9c   :  { %1863 = vmatpush3.msra.mxu1 %v2830_v1  ;;  %1834 = vmatpush3.msra.mxu0 %v2239_v45 }
  0x9d   :  { %1864 = vmatprep.subr.mxu1 %v2810_v0  ;;  %1835 = vmatprep.subr.mxu0 %v2810_v0 }
  0x9e   :  { %1865 = vmatpush3.msra.mxu1 %v2831_v26  ;;  %1836 = vmatpush3.msra.mxu0 %v2249_v48 }
  0x9f   :  { %1866 = vmatprep.subr.mxu1 %v2810_v0  ;;  %1837 = vmatprep.subr.mxu0 %v2810_v0 }
  0xa0   :  { %1867 = vmatpush3.msra.mxu1 %v2832_v42  ;;  %1880 = vmatprep.mubr.msk.f32.mxu1 %vm2109_vm0, %v2810_v0 }
  0xa1   :  { %1868 = vmatprep.subr.mxu1 %v2810_v0  ;;  %1838 = vmatpush3.msra.mxu0 %v2276_v59 }
  0xa2   :  { %1869 = vmatpush3.msra.mxu1 %v2369_v60  ;;  %1839 = vmatprep.subr.mxu0 %v2810_v0 }
  0xa3   :  { %1870 = vmatprep.subr.mxu1 %v2810_v0  ;;  %1840 = vmatpush3.msra.mxu0 %v2286_v63 }
  0xa4   :  { %1871 = vmatpush3.msra.mxu1 %v2383_v49  ;;  %1841 = vmatprep.subr.mxu0 %v2810_v0 }
  0xa5   :  { %1872 = vmatprep.subr.mxu1 %v2810_v0  ;;  %1842 = vmatpush3.msra.mxu0 %v2304_v13 }
  0xa6   :  { %1873 = vmatpush3.msra.mxu1 %v2394_v56  ;;  %1843 = vmatprep.subr.mxu0 %v2810_v0 }
  0xa7   :  { %1874 = vmatprep.subr.mxu1 %v2810_v0  ;;  %1844 = vmatpush3.msra.mxu0 %v2322_v32 }
  0xa8   :  { %1875 = vmatpush3.msra.mxu1 %v2402_v2  ;;  %1845 = vmatprep.mubr.msk.f32.mxu0 %vm2109_vm0, %v2810_v0 }
  0xa9   :  { %1876 = vmatprep.subr.mxu1 %v2810_v0  ;;  %1883 = vmatprep.subr.mxu0 %v2810_v0 }
  0xaa   :  { %1877 = vmatpush3.msra.mxu1 %v2409_v14 }
  0xab   :  { %1878 = vmatprep.subr.mxu1 %v2810_v0 }
  0xac   :  { %1879 = vmatpush3.msra.mxu1 %v2415_v33 }
  0xad   :  { %1918 = vmatprep.subr.mxu1 %v2810_v0 }
 0x102   :  { %v150_v56 = vpop.f32.mrf.mxu0 }
 0x104   :  { %v1637_v60 = vpop.f32.mrf.mxu0 }
 0x109   :  { %v301_v49 = vpop.f32.mrf.mxu1 }
 0x10a   :  { %v302_v62 = vadd.f32 %v301_v49, %v150_v56  ;;  %v2834_v56 = vmov 0.0  }
 0x10b   :  { %v1672_v9 = vpop.f32.mrf.mxu1 }
 0x122   :  { %v405_v2 = vpop.f32.mrf.mxu0 }
 0x123   :  { %v406_v26 = vadd.f32 %v405_v2, %v302_v62 }
 0x124   :  { %v1707_v51 = vpop.f32.mrf.mxu0 }
 0x12b   :  { %v494_v37 = vpop.f32.mrf.mxu1 }
 0x12c   :  { %v495_v42 = vadd.f32 %v494_v37, %v406_v26 }
 0x12d   :  { %v1742_v38 = vpop.f32.mrf.mxu1 }
 0x144   :  { %v613_v44 = vpop.f32.mrf.mxu0 }
 0x145   :  { %v614_v14 = vadd.f32 %v613_v44, %v495_v42 }
 0x146   :  { %v1777_v1 = vpop.f32.mrf.mxu0 }
 0x14d   :  { %v700_v36 = vpop.f32.mrf.mxu1 }
 0x14e   :  { %v701_v7 = vadd.f32 %v700_v36, %v614_v14 }
 0x14f   :  { %v1812_v52 = vpop.f32.mrf.mxu1 }
 0x150   :  { %v704_v33 = vmul.f32 0.03125, %v701_v7 }
 0x152   :  { %v2631_v0 = vsub.f32 %v2833_v58, %v704_v33 }
 0x154   :  { %v706_v60 = vmul.f32 %v2631_v0, %v2631_v0 }
 0x156   :  { %v2635_v9 = vand.u32 4294901760, %v706_v60 }
 0x158   :  { %v2638_v51 = vsub.f32 %v706_v60, %v2635_v9  ;;  %1881 = vmatmul.mubr.f32.vlgmr.msra.gmra.mxu1 %v2635_v9 }
 0x159   :  { %1919 = vmatpush3.msra.mxu1 %v2151_v4  ;;  %1950 = vmatprep.mubr.msk.f32.mxu1 %vm2109_vm0, %v2834_v56 }
 0x15a   :  { %1920 = vmatprep.subr.mxu1 %v2834_v56  ;;  %v790_v52 = vand.u32 4294901760, %v2638_v51 }
 0x15b   :  { %1921 = vmatpush3.msra.mxu1 %v2153_v5 }
 0x15c   :  { %1922 = vmatprep.subr.mxu1 %v2834_v56  ;;  %v791_v58 = vsub.f32 %v2638_v51, %v790_v52 }
 0x15d   :  { %1923 = vmatpush3.msra.mxu1 %v2155_v6 }
 0x15e   :  { %1924 = vmatprep.subr.mxu1 %v2834_v56  ;;  %v792_v7 = vand.u32 4294901760, %v791_v58 }
 0x15f   :  { %1925 = vmatpush3.msra.mxu1 %v2157_v10 }
 0x160   :  { %1926 = vmatprep.subr.mxu1 %v2834_v56  ;;  %1846 = vmatmul.mubr.f32.vlgmr.msra.gmra.mxu0 %v792_v7 }
 0x161   :  { %1884 = vmatpush3.msra.mxu0 %v2165_v15  ;;  %1927 = vmatpush3.msra.mxu1 %v2159_v11 }
 0x162   :  { %1885 = vmatprep.subr.mxu0 %v2834_v56  ;;  %1928 = vmatprep.subr.mxu1 %v2834_v56 }
 0x163   :  { %1886 = vmatpush3.msra.mxu0 %v2168_v16  ;;  %1929 = vmatpush3.msra.mxu1 %v2161_v12 }
 0x164   :  { %1887 = vmatprep.subr.mxu0 %v2834_v56  ;;  %1930 = vmatprep.subr.mxu1 %v2834_v56 }
 0x165   :  { %1888 = vmatpush3.msra.mxu0 %v2173_v18  ;;  %1931 = vmatpush3.msra.mxu1 %v2170_v17 }
 0x166   :  { %1889 = vmatprep.subr.mxu0 %v2834_v56  ;;  %1932 = vmatprep.subr.mxu1 %v2834_v56 }
 0x167   :  { %1890 = vmatpush3.msra.mxu0 %v2177_v20  ;;  %1933 = vmatpush3.msra.mxu1 %v2192_v25 }
 0x168   :  { %1891 = vmatprep.subr.mxu0 %v2834_v56  ;;  %1934 = vmatprep.subr.mxu1 %v2834_v56 }
 0x169   :  { %1892 = vmatpush3.msra.mxu0 %v2180_v21  ;;  %1935 = vmatpush3.msra.mxu1 %v2198_v28 }
 0x16a   :  { %1893 = vmatprep.subr.mxu0 %v2834_v56  ;;  %1936 = vmatprep.subr.mxu1 %v2834_v56 }
 0x16b   :  { %1894 = vmatpush3.msra.mxu0 %v2204_v30  ;;  %1937 = vmatpush3.msra.mxu1 %v2217_v35 }
 0x16c   :  { %1895 = vmatprep.subr.mxu0 %v2834_v56  ;;  %1938 = vmatprep.subr.mxu1 %v2834_v56 }
 0x16d   :  { %1896 = vmatpush3.msra.mxu0 %v2214_v34  ;;  %1939 = vmatpush3.msra.mxu1 %v2239_v45 }
 0x16e   :  { %1897 = vmatprep.subr.mxu0 %v2834_v56  ;;  %1940 = vmatprep.subr.mxu1 %v2834_v56 }
 0x16f   :  { %1898 = vmatpush3.msra.mxu0 %v2233_v43  ;;  %1941 = vmatpush3.msra.mxu1 %v2249_v48 }
 0x170   :  { %1899 = vmatprep.subr.mxu0 %v2834_v56  ;;  %1942 = vmatprep.subr.mxu1 %v2834_v56 }
 0x171   :  { %1900 = vmatpush3.msra.mxu0 %v2245_v47  ;;  %1943 = vmatpush3.msra.mxu1 %v2276_v59 }
 0x172   :  { %1901 = vmatprep.subr.mxu0 %v2834_v56  ;;  %1944 = vmatprep.subr.mxu1 %v2834_v56 }
 0x173   :  { %1902 = vmatpush3.msra.mxu0 %v2263_v55  ;;  %1945 = vmatpush3.msra.mxu1 %v2286_v63 }
 0x174   :  { %1903 = vmatprep.subr.mxu0 %v2834_v56  ;;  %1946 = vmatprep.subr.mxu1 %v2834_v56 }
 0x175   :  { %1904 = vmatpush3.msra.mxu0 %v2279_v61  ;;  %1947 = vmatpush3.msra.mxu1 %v2304_v13 }
 0x176   :  { %1905 = vmatprep.subr.mxu0 %v2834_v56  ;;  %1948 = vmatprep.subr.mxu1 %v2834_v56 }
 0x177   :  { %1906 = vmatpush3.msra.mxu0 %v2298_v8  ;;  %1949 = vmatpush3.msra.mxu1 %v2322_v32 }
 0x178   :  { %1907 = vmatprep.subr.mxu0 %v2834_v56  ;;  %1951 = vmatmul.mubr.f32.vlgmr.msra.gmra.mxu1 %v790_v52 }
 0x179   :  { %1988 = vmatprep.subr.mxu1 %v2834_v56  ;;  %1908 = vmatpush3.msra.mxu0 %v2318_v31 }
 0x17a   :  { %1989 = vmatpush3.msra.mxu1 %v2151_v4  ;;  %1909 = vmatprep.subr.mxu0 %v2834_v56  ;;  %v2835_v4 = vld [vmem:[#allocation18_spill] sm:$0xff] }
 0x17b   :  { %1990 = vmatprep.subr.mxu1 %v2834_v56  ;;  %1910 = vmatpush3.msra.mxu0 %v2334_v41 }
 0x17c   :  { %1991 = vmatpush3.msra.mxu1 %v2153_v5  ;;  %1911 = vmatprep.subr.mxu0 %v2834_v56  ;;  %v2836_v5 = vld [vmem:[#allocation20_spill] sm:$0xff] }
 0x17d   :  { %1992 = vmatprep.subr.mxu1 %v2834_v56  ;;  %1912 = vmatpush3.msra.mxu0 %v2349_v54 }
 0x17e   :  { %1993 = vmatpush3.msra.mxu1 %v2155_v6  ;;  %1913 = vmatprep.subr.mxu0 %v2834_v56  ;;  %v2837_v6 = vld [vmem:[#allocation21_spill] sm:$0xff] }
 0x17f   :  { %1994 = vmatprep.subr.mxu1 %v2834_v56  ;;  %1914 = vmatpush3.msra.mxu0 %v2363_v50 }
 0x180   :  { %1915 = vmatprep.mubr.msk.f32.mxu0 %vm2109_vm0, %v2834_v56  ;;  %1995 = vmatpush3.msra.mxu1 %v2157_v10  ;;  %v2838_v10 = vld [vmem:[#allocation22_spill] sm:$0xff] }
 0x181   :  { %1916 = vmatmul.mubr.f32.vlgmr.msra.gmra.mxu0 %v2638_v51  ;;  %1953 = vmatprep.subr.mxu0 %v2834_v56 }
 0x182   :  { %1996 = vmatprep.subr.mxu1 %v2834_v56  ;;  %1954 = vmatpush3.msra.mxu0 %v2184_v22 }
 0x183   :  { %1997 = vmatpush3.msra.mxu1 %v2159_v11  ;;  %1955 = vmatprep.subr.mxu0 %v2834_v56 }
 0x184   :  { %1998 = vmatprep.subr.mxu1 %v2834_v56  ;;  %1956 = vmatpush3.msra.mxu0 %v2187_v23 }
 0x185   :  { %1999 = vmatpush3.msra.mxu1 %v2161_v12  ;;  %1957 = vmatprep.subr.mxu0 %v2834_v56 }
 0x186   :  { %2000 = vmatprep.subr.mxu1 %v2834_v56  ;;  %1958 = vmatpush3.msra.mxu0 %v2190_v24 }
 0x187   :  { %2001 = vmatpush3.msra.mxu1 %v2170_v17  ;;  %1959 = vmatprep.subr.mxu0 %v2834_v56 }
 0x188   :  { %2002 = vmatprep.subr.mxu1 %v2834_v56  ;;  %1960 = vmatpush3.msra.mxu0 %v2196_v27 }
 0x189   :  { %2003 = vmatpush3.msra.mxu1 %v2192_v25  ;;  %1961 = vmatprep.subr.mxu0 %v2834_v56 }
 0x18a   :  { %2004 = vmatprep.subr.mxu1 %v2834_v56  ;;  %1962 = vmatpush3.msra.mxu0 %v2201_v29 }
 0x18b   :  { %2005 = vmatpush3.msra.mxu1 %v2198_v28  ;;  %1963 = vmatprep.subr.mxu0 %v2834_v56 }
 0x18c   :  { %2006 = vmatprep.subr.mxu1 %v2834_v56  ;;  %1964 = vmatpush3.msra.mxu0 %v2227_v40 }
 0x18d   :  { %2007 = vmatpush3.msra.mxu1 %v2217_v35  ;;  %1965 = vmatprep.subr.mxu0 %v2834_v56 }
 0x18e   :  { %2008 = vmatprep.subr.mxu1 %v2834_v56  ;;  %1966 = vmatpush3.msra.mxu0 %v2242_v46 }
 0x18f   :  { %2009 = vmatpush3.msra.mxu1 %v2239_v45  ;;  %1967 = vmatprep.subr.mxu0 %v2834_v56 }
 0x190   :  { %2010 = vmatprep.subr.mxu1 %v2834_v56  ;;  %1968 = vmatpush3.msra.mxu0 %v2260_v53 }
 0x191   :  { %2011 = vmatpush3.msra.mxu1 %v2249_v48  ;;  %1969 = vmatprep.subr.mxu0 %v2834_v56 }
 0x192   :  { %2012 = vmatprep.subr.mxu1 %v2834_v56  ;;  %1970 = vmatpush3.msra.mxu0 %v2270_v57 }
 0x193   :  { %2013 = vmatpush3.msra.mxu1 %v2276_v59  ;;  %1971 = vmatprep.subr.mxu0 %v2834_v56  ;;  %v1397_v59 = vld [vmem:[%s2794_s1] ss:$0 sm:$0xff] }
 0x194   :  { %2014 = vmatprep.subr.mxu1 %v2834_v56  ;;  %1972 = vmatpush3.msra.mxu0 %v2295_v3 }
 0x195   :  { %2015 = vmatpush3.msra.mxu1 %v2286_v63  ;;  %1973 = vmatprep.subr.mxu0 %v2834_v56  ;;  %v1398_v63 = vld [vmem:[%s2795_s2] ss:$0 sm:$0xff] }
 0x196   :  { %2016 = vmatprep.subr.mxu1 %v2834_v56  ;;  %1974 = vmatpush3.msra.mxu0 %v2311_v19 }
 0x197   :  { %2017 = vmatpush3.msra.mxu1 %v2304_v13  ;;  %1975 = vmatprep.subr.mxu0 %v2834_v56 }
 0x198   :  { %2018 = vmatprep.subr.mxu1 %v2834_v56  ;;  %1976 = vmatpush3.msra.mxu0 %v2331_v39 }
 0x199   :  { %2019 = vmatpush3.msra.mxu1 %v2322_v32  ;;  %2020 = vmatprep.mubr.msk.f32.mxu1 %vm2109_vm0, %v2834_v56 }
 0x19a   :  { %1977 = vmatprep.subr.mxu0 %v2834_v56  ;;  %2021 = vmatmul.mubr.f32.vlgmr.msra.gmra.mxu1 %v2635_v9 }
 0x19b   :  { %1978 = vmatpush3.msra.mxu0 %v2835_v4  ;;  %1985 = vmatprep.mubr.msk.f32.mxu0 %vm2109_vm0, %v2834_v56 }
 0x19c   :  { %1979 = vmatprep.subr.mxu0 %v2834_v56 }
 0x19d   :  { %1980 = vmatpush3.msra.mxu0 %v2836_v5 }
 0x19e   :  { %1981 = vmatprep.subr.mxu0 %v2834_v56 }
 0x19f   :  { %1982 = vmatpush3.msra.mxu0 %v2837_v6 }
 0x1a0   :  { %1983 = vmatprep.subr.mxu0 %v2834_v56 }
 0x1a1   :  { %1984 = vmatpush3.msra.mxu0 %v2838_v10 }
 0x1a2   :  { %1986 = vmatmul.mubr.f32.vlgmr.msra.gmra.mxu0 %v2635_v9 }
 0x218   :  { %v945_v11 = vpop.f32.mrf.mxu1 }
 0x21a   :  { %v1882_v12 = vpop.f32.mrf.mxu1 }
 0x220   :  { %v794_v15 = vpop.f32.mrf.mxu0 }
 0x221   :  { %v946_v23 = vadd.f32 %v945_v11, %v794_v15 }
 0x222   :  { %v1847_v16 = vpop.f32.mrf.mxu0 }
 0x238   :  { %v1138_v17 = vpop.f32.mrf.mxu1 }
 0x23a   :  { %v1952_v18 = vpop.f32.mrf.mxu1 }
 0x241   :  { %v1049_v20 = vpop.f32.mrf.mxu0 }
 0x242   :  { %v1050_v25 = vadd.f32 %v1049_v20, %v946_v23 }
 0x243   :  { %v1917_v21 = vpop.f32.mrf.mxu0 }
 0x244   :  { %v1139_v27 = vadd.f32 %v1138_v17, %v1050_v25 }
 0x25a   :  { %v1344_v22 = vpop.f32.mrf.mxu1 }
 0x25c   :  { %v2022_v24 = vpop.f32.mrf.mxu1 }
 0x262   :  { %v1257_v28 = vpop.f32.mrf.mxu0 }
 0x263   :  { %v1258_v29 = vadd.f32 %v1257_v28, %v1139_v27 }
 0x264   :  { %v1987_v30 = vpop.f32.mrf.mxu0 }
 0x265   :  { %v1345_v34 = vadd.f32 %v1344_v22, %v1258_v29 }
 0x267   :  { %v1348_v35 = vmul.f32 0.032258064, %v1345_v34 }
 0x269   :  { %2032 = vrsqrt.f32 %v1348_v35  ;;  %vm1351_vm1 = vcmp.eq.f32.partialorder %v1348_v35, inf  ;;  %v1354_v45 = vand.u32 2147483648, %v1348_v35  ;;  %vm1353_vm2 = vcmp.eq.f32.partialorder %v1348_v35, 0.0 }
 0x276   :  { %v2033_v40 = vpop.eup %2032 }
 0x277   :  { %v1350_v43 = vmul.f32 %v2033_v40, %v1348_v35 }
 0x279   :  { %v1352_v46 = vsel %vm1351_vm1, %v1348_v35, %v1350_v43 }
 0x27a   :  { %v1355_v47 = vsel %vm1353_vm2, %v1354_v45, %v1352_v46 }
 0x27b   :  { %v1356_v48 = vadd.f32 1e-06, %v1355_v47 }
 0x27d   :  { %2034 = vrcp.f32 %v1356_v48 }
 0x28a   :  { %v2035_v50 = vpop.eup %2034 }
 0x28b   :  { %v1358_v53 = vmul.f32 %v2035_v50, %v1356_v48 }
 0x28d   :  { %v1359_v55 = vsub.f32 2.0, %v1358_v53 }
 0x28f   :  { %v1360_v57 = vmul.f32 %v2035_v50, %v1359_v55 }
 0x291   :  { %v1363_v61 = vmul.f32 %v1360_v57, %v2631_v0 }
 0x293   :  { %v1370_v3 = vmul.f32 %v1397_v59, %v1363_v61 }
 0x295   :  { %v1377_v8 = vadd.f32 %v1398_v63, %v1370_v3 }
 0x297   :  { %1378 = vst [vmem:[#allocation7] sm:$0xff] %v1377_v8 }
 0x298   :  { %1383 = vsyncadd [#allocation4], 64  ;;  %s2110_s6 = smov [#allocation7]  }
 0x299   :  { %s1384_s7 = sshll.u32 %s2110_s6, 4  ;;  %s1385_s7 = int_to_ptr.vmem [resolvable:$true] %s1384_s7 }
 0x29a   :  { %s2076_s8 = scalar_lea.vmem %s1385_s7, 64  ;;  %s2080_s9 = scalar_lea.vmem %s1385_s7, 128 }
 0x29b   :  { %p2077_p10 = scmp.ne.s32.totalorder %s1385_s7, %s2076_s8  ;;  %p2081_p11 = scmp.lt.s32.totalorder %s1385_s7, %s1385_s7 }
 0x29c   :  { %p2082_p12 = scmp.lt.s32.totalorder %s2080_s9, %s2076_s8 }
 0x29e   :  { %p2083_p13 = por %p2082_p12, %p2081_p11 }
 0x2a0   :  { %p2084_p0 = pnand %p2083_p13, %p2077_p10 }
 0x2a2   :  { %2087 = shalt.err (!%p2084_p0)
}
 0x2a3   :  { %1390 = dma.vmem_to_hbm [thread:$0]  %s1385_s7, 64, %s2797_s4, [#allocation4], %s2103_s19, %s2103_s19, %s2104_s20  }
 0x2a4   :  { %2100 = dma.done.wait [#allocation4], 128  }
 0x2a5   :  { %2101 = vsyncadd [#allocation4], 4294967168 }
 0x2a6   :  { %1394 = vsyncpa [#allocation3], 1 }
 0x2a7   :  { %1395 = vsyncpa [#allocation6], 1 }
 0x2a8   :  { %1396 = vsyncpa [#allocation4], 1 }

</bundles_post_ra>
